<compile_context>
chip_gen: v6e
topology: v6e:2x2x1
jax: 0.10.0
libtpu: 0.0.40
codegen_flags: <defaults>
</compile_context>

<pallas_src>
from functools import partial

import numpy as np
import jax
import jax.numpy as jnp
from jax.experimental import pallas as pl
from jax.experimental.pallas import tpu as pltpu


def _zero_kernel(idx_ref, x_any_ref, o_ref):
    # idx_ref:   SMEM int32 (num_ablated,) -- consumed only by the index_maps.
    # x_any_ref: raw HBM ref of the whole input (memory_space=pl.ANY).  Never
    #            read; present only so it can be aliased to the output and
    #            non-ablated channels keep their data with zero traffic.
    # o_ref:     VMEM (1, blk_rows, 128) output block -> overwrite with zeros.
    del idx_ref, x_any_ref
    o_ref[...] = jnp.zeros_like(o_ref)


def _pallas_ablate_impl(x, idx, *, c, rows, lane, blk_rows, n_abl):
    orig_shape = x.shape
    x3 = x.reshape(c, rows, lane)  # dense (sublane, lane) view of each channel
    bytes_touched = n_abl * rows * lane * x.dtype.itemsize

    out3 = pl.pallas_call(
        _zero_kernel,
        out_shape=jax.ShapeDtypeStruct((c, rows, lane), x.dtype),
        grid_spec=pltpu.PrefetchScalarGridSpec(
            num_scalar_prefetch=1,
            grid=(n_abl, pl.cdiv(rows, blk_rows)),
            in_specs=[
                # No block_shape / index_map: the input stays in HBM and is
                # never DMA'd -- the kernel is write-only on the ablated tiles.
                pl.BlockSpec(memory_space=pl.ANY),
            ],
            out_specs=pl.BlockSpec(
                (1, blk_rows, lane),
                lambda i, j, idx_ref: (idx_ref[i], j, 0),
            ),
        ),
        # Input indices count the scalar-prefetch operand: 0 = idx, 1 = x3.
        # Aliasing x3 -> output 0 means unvisited (non-ablated) channels keep
        # x's data without ever being read or written by the kernel.
        input_output_aliases={1: 0},
        compiler_params=pltpu.CompilerParams(
            dimension_semantics=("parallel", "parallel"),
        ),
        # Tiny, write-only custom call: tell the XLA scheduler so it doesn't
        # serialize surrounding work around an assumed-expensive op.
        cost_estimate=pl.CostEstimate(
            flops=0, transcendentals=0, bytes_accessed=bytes_touched
        ),
    )(idx, x3)

    return out3.reshape(orig_shape)


# Donating variant (default): aliases the caller's buffer in place, no copy.
_pallas_ablate_donate = jax.jit(
    _pallas_ablate_impl,
    static_argnames=("c", "rows", "lane", "blk_rows", "n_abl"),
    donate_argnames=("x",),
)
# Non-donating variant (keeps caller's x valid at the cost of a defensive copy).
_pallas_ablate_nodonate = jax.jit(
    _pallas_ablate_impl,
    static_argnames=("c", "rows", "lane", "blk_rows", "n_abl"),
)


def _default_block_bytes():
    """Per-generation output block target (only the output is double-buffered)."""
    try:
        kind = jax.devices()[0].device_kind.lower()
    except Exception:  # pragma: no cover - defensive
        kind = ""
    if "v7" in kind:
        return 4 << 20  # ~4 MiB blocks, 8 MiB double-buffered, 3.2 TB/s HBM
    if "v6" in kind:
        return 2 << 20
    if "v5" in kind:
        return 1 << 20
    return 2 << 20


def ablate(x, params, indicies, *, donate=True, min_pallas_bytes=1 << 20,
           block_bytes=None):
    """Pallas equivalent of Ablate.forward(x, params, indicies).

    `params` is unused (matching the PyTorch module's signature).
    When `donate=True` (default) and the Pallas path is taken, `x` is donated
    and must not be reused by the caller.
    """
    del params
    n, c, h, w = x.shape
    assert n == 1, "Ablate (like the torch squeeze/unsqueeze) assumes batch size 1"

    # Unique, in-range channels to zero.  Out-of-range entries never match in
    # the torch loop either, so they are dropped.
    idx_list = sorted({int(i) for i in indicies if 0 <= int(i) < c})
    if not idx_list:
        return x  # nothing to ablate -> identity

    hw = h * w
    itemsize = jnp.dtype(x.dtype).itemsize
    lane = 128

    # Fast path: tiny ablations (pallas_call dispatch + per-step overhead would
    # dominate) or shapes that don't tile into dense 128-lane rows.
    touched_bytes = len(idx_list) * hw * itemsize
    if touched_bytes < min_pallas_bytes or hw % lane != 0:
        mask = np.zeros((c,), dtype=bool)
        mask[idx_list] = True
        return jnp.where(jnp.asarray(mask)[None, :, None, None],
                         jnp.zeros((), x.dtype), x)

    rows = hw // lane
    # Dense packed-store sublane group per dtype (f32: 8, bf16: 16, int8: 32).
    sub = {4: 8, 2: 16, 1: 32}.get(itemsize, 8)

    if block_bytes is None:
        block_bytes = _default_block_bytes()
    target_rows = max(sub, (block_bytes // (lane * itemsize)) // sub * sub)

    if rows <= target_rows:
        blk_rows = rows  # full dim -> always a legal block shape
    else:
        blk_rows = target_rows
        # Prefer a sublane-group multiple that divides `rows` so the last j
        # block isn't a masked ragged edge.
        while blk_rows > sub and rows % blk_rows:
            blk_rows -= sub
        if rows % blk_rows:
            # No nice divisor: accept one masked edge block (Pallas masks
            # out-of-bounds output writes).
            blk_rows = target_rows

    idx = jnp.asarray(np.asarray(idx_list, dtype=np.int32))
    fn = _pallas_ablate_donate if donate else _pallas_ablate_nodonate
    return fn(x, idx, c=c, rows=rows, lane=lane, blk_rows=blk_rows,
              n_abl=len(idx_list))


if __name__ == "__main__":
    key = jax.random.PRNGKey(0)
    N, C, H, W = 1, 4, 16, 16
    x = jax.random.normal(key, (N, C, H, W), dtype=jnp.float32)
    x_np = np.asarray(x)  # host copy (kept valid regardless of donation)
    indicies = [0, 2]     # zero out channels 0 and 2

    # Pure-numpy reference (exact: zero or passthrough).
    mask = np.zeros((C,), dtype=bool)
    mask[indicies] = True
    ref = np.where(mask[None, :, None, None], np.float32(0.0), x_np)

    # 1) Pallas kernel path (forced even at this tiny shape); uses a fresh
    #    device copy because the default path donates its input.
    x_pallas = jnp.asarray(x_np)
    out = jax.block_until_ready(ablate(x_pallas, None, indicies,
                                       min_pallas_bytes=0))
    np.testing.assert_allclose(np.asarray(out), ref, rtol=0, atol=0)

    # 2) Default dispatch: this small ablation takes the fused jnp.where path.
    out_fast = jax.block_until_ready(ablate(x, None, indicies))
    np.testing.assert_allclose(np.asarray(out_fast), ref, rtol=0, atol=0)

    print("KERNEL_OK")
</pallas_src>

<mosaic_0001>
module attributes {stable_mosaic.version = 11 : i64} {
  func.func @_zero_kernel(%arg0: i32, %arg1: i32, %arg2: memref<2xi32, #tpu.memory_space<smem>>, %arg3: memref<4x2x128xf32, #tpu.memory_space<any>>, %arg4: memref<1x2x128xf32, #tpu.memory_space<vmem>>) attributes {dimension_semantics = [#tpu.dimension_semantics<parallel>, #tpu.dimension_semantics<parallel>], iteration_bounds = array<i64: 2, 1>, scalar_prefetch = 1 : i64, scratch_operands = 0 : i64, tpu.core_type = #tpu.core_type<tc>, window_params = [{}, {transform_indices = @transform_1, window_bounds = array<i64: 1, 2, 128>}]} {
    %cst = arith.constant 0.000000e+00 : f32
    %0 = vector.broadcast %cst : f32 to vector<1x2x128xf32>
    %c0 = arith.constant 0 : index
    %c0_0 = arith.constant 0 : index
    %c0_1 = arith.constant 0 : index
    %1 = vector.load %arg4[%c0, %c0_0, %c0_1] : memref<1x2x128xf32, #tpu.memory_space<vmem>>, vector<1x2x128xf32>
    tpu.vector_store %arg4[%c0, %c0_0, %c0_1], %0 {strides = array<i32>} : memref<1x2x128xf32, #tpu.memory_space<vmem>>, vector<1x2x128xf32>,
    return
  }
  func.func @transform_1(%arg0: i32, %arg1: i32, %arg2: memref<2xi32, #tpu.memory_space<smem>>) -> (i32, i32, i32) {
    %0 = arith.index_cast %arg0 : i32 to index
    %1 = memref.load %arg2[%0] : memref<2xi32, #tpu.memory_space<smem>>
    %c0_i32 = arith.constant 0 : i32
    %c0_i32_0 = arith.constant 0 : i32
    return %1, %arg1, %c0_i32 : i32, i32, i32
  }
}

</mosaic_0001>

<bundles_post_ra>
// kernel: _pallas_ablate_impl.1
= control target key start
LH: loop header
LB: loop body
LE: loop exit
PB: predicated region body
PF: predicated region fallthrough
CT: control target
= control target key end

     0   :  { %s209_s0 = inlined_call_operand.vmem [shape: s32[2], index: 0, kind: input, shape index: {}]   ;;  %s210_s1 = inlined_call_operand.vmem [shape: f32[4,2,128], index: 1, kind: input, shape index: {}, may-alias: {1,2}]   ;;  %s211_s2 = inlined_call_operand.vmem [shape: f32[4,2,128], index: 2, kind: output, shape index: {}, may-alias: {1,2}]  }
   0x1   :  { %s7_s11 = sshll.u32 %s209_s0, 4  ;;  %s8_s11 = int_to_ptr.vmem [resolvable:$true] %s7_s11 }
   0x2   :  { %s156_s12 = scalar_lea.vmem %s8_s11, 16  ;;  %p161_p1 = scmp.lt.s32.totalorder %s8_s11, %s8_s11 }
   0x3   :  { %p157_p0 = scmp.ne.s32.totalorder %s8_s11, %s156_s12  ;;  %p162_p2 = scmp.lt.s32.totalorder %s156_s12, %s156_s12 }
   0x5   :  { %p163_p3 = por %p162_p2, %p161_p1 }
   0x7   :  { %p164_p4 = pnand %p163_p3, %p157_p0 }
   0x9   :  { %167 = shalt.err (!%p164_p4)  }
   0xa   :  { %s186_s13 = smov [#allocation3]  }
   0xb   :  { %10 = dma.vmem_to_smem %s8_s11, 16, %s186_s13, [#allocation2] }
   0xc   :  { %176 = dma.done.wait [#allocation2], 16 }
   0xd   :  { %177 = vsyncadd [#allocation2], 4294967280 }
   0xe   :  { %12 = sfence }
   0xf   :  { %s178_s1 = smov 0   ;;  %s182_s14 = smov 0  }
  0x10 LB: > { %s27_s0 = sadd.s32 1, %s180_s1  ;;  %p134_p6 = scmp.ge.s32.totalorder %s184_s14, 2  ;;  %s184_s14 = sphi %s182_s14, %s18_s14   ;;  %s180_s1 = sphi %s178_s1, %s179_s1  }
  0x11   : > { %p29_p5 = scmp.ge.s32.totalorder %s27_s0, 2  ;;  %s68_s15 = sld [smem:[#allocation3 + %s180_s1]] (!%p134_p6) }
  0x12   : > { %57 = sbr.rel (%p134_p6) target bundleno = 29 (0x1d), region = 12 }
  0x13   : > { %s213_s0 = smov (%p29_p5, %s27_s0), 0 }
  0x17   : > { %p69_p7 = scmp.lt.s32.totalorder %s68_s15, 3  ;;  %v187_v0 = vmov 0.0  }
  0x19   : > { %s215_s15 = smov (!%p69_p7, %s68_s15), 3 }
  0x1a   : > { %s135_s16 = sshll.u32 %s215_s15, 1 }
  0x1b   : > { %s75_s19 = scalar_lea.vmem %s211_s2, %s135_s16 }
  0x1c   : > { %77 = vst [vmem:[%s75_s19] sm:$0x3] %v187_v0 }
  0x1d PF: > { %s18_s14 = sadd.s32 1, %s184_s14   ;;  %s179_s1 = smov %s213_s0  }
  0x1e   : > { %p15_p8 = scmp.ge.s32.totalorder %s18_s14, 3  }
  0x20   :  { %17 = sbr.rel (!%p15_p8) target bundleno = 16 (0x10), region = 39 }

</bundles_post_ra>
